<compile_context>
chip_gen: v6e
topology: v6e:2x2x1
jax: 0.10.0
libtpu: 0.0.40
codegen_flags: <defaults>
</compile_context>

<pallas_src>
import jax
import jax.numpy as jnp
from jax.experimental import pallas as pl
from jax.experimental.pallas import tpu as pltpu


# ----------------------------------------------------------------------------
# Pallas kernel: fused coord-grid -> Fourier encoding -> MLP, transposed layout.
# ----------------------------------------------------------------------------
def _make_inr_kernel(H, W, L, n_layers, tile_n):
    lo = -1.0
    r_h = (1.0 - lo) / (2 * H)
    r_w = (1.0 - lo) / (2 * W)

    def kernel(bias_ref, *refs):
        out_ref = refs[-1]
        wb = refs[:-1]                                     # (w0T, b0, w1T, b1, ...)
        bias = bias_ref[0]

        # Flat coordinate-row indices handled by this tile, lane-dense (1, tile_n).
        n_flat = (jax.lax.broadcasted_iota(jnp.int32, (1, tile_n), 1)
                  + pl.program_id(0) * tile_n)

        # h_idx = n // W, w_idx = n % W.  The VPU has no vector integer divide, so
        # estimate in f32 and apply a +/-1 correction (exact for n < 2**24, i.e.
        # images up to ~4096x4096 coordinates).
        q = jnp.floor((n_flat.astype(jnp.float32) + 0.5) * (1.0 / W)).astype(jnp.int32)
        r = n_flat - q * W
        h_idx = jnp.where(r < 0, q - 1, jnp.where(r >= W, q + 1, q))
        w_idx = jnp.where(r < 0, r + W, jnp.where(r >= W, r - W, r))

        # Same math as the PyTorch grid construction (torch.meshgrid indexing='ij',
        # row-major flatten).  NOTE: the torch.where(...) clamps in the original
        # discard their results (no-op); reproduced as such.
        gh = lo + r_h + 2.0 * r_h * h_idx.astype(jnp.float32) + (r_h / 100.0) * bias
        gw = lo + r_w + 2.0 * r_w * w_idx.astype(jnp.float32) + (r_w / 100.0) * bias
        coord = jnp.concatenate([gh, gw], axis=0)          # (2, tile_n)

        # TODO(synk): `input_mapping` is not defined in the source snippet; implemented as
        # the standard NeRF positional encoding giving 4L+2 features: [x, sin/cos(2^j*pi*x)].
        feats = [coord]
        for j in range(L):
            f = (2.0 ** j) * jnp.pi
            feats.append(jnp.sin(f * coord))
            feats.append(jnp.cos(f * coord))
        h = jnp.concatenate(feats, axis=0)                 # (4L+2, tile_n)

        # Transposed MLP: h_{l+1} = W_l^T @ h_l + b_l, ReLU except the last layer.
        for layer in range(n_layers):
            wT = wb[2 * layer][...]                        # (d_out, d_in)
            b = wb[2 * layer + 1][...]                     # (d_out, 1)
            h = jnp.dot(wT, h, preferred_element_type=jnp.float32) + b
            if layer < n_layers - 1:
                h = jnp.maximum(h, 0.0)                    # ReLU
        out_ref[...] = h.astype(out_ref.dtype)

    return kernel


# ----------------------------------------------------------------------------
# Wrapper.
# ----------------------------------------------------------------------------
def _round_up(x, m):
    return ((x + m - 1) // m) * m


def _choose_tile(N, max_tile=4096, min_tile=128):
    # Big tiles amortize per-grid-step overhead; keep >= ~8 steps so the parallel
    # grid axis can still shard across both v7x TensorCores.
    return max(min_tile, min(max_tile, _round_up(pl.cdiv(N, 8), min_tile)))


def inr_forward(x, bias, weights, biases, L, tile_n=None):
    """x: (B, C, H, W) (only H, W are read).  weights[i]: (d_i, d_{i+1}).  biases[i]: (d_{i+1},)."""
    H, W = int(x.shape[-2]), int(x.shape[-1])
    N = H * W
    if tile_n is None:
        tile_n = _choose_tile(N)
    N_pad = _round_up(N, tile_n)
    n_layers = len(weights)
    out_dim = int(weights[-1].shape[1])

    bias_arr = jnp.asarray(bias, dtype=jnp.float32).reshape(1)

    in_specs, flat_wb = [], []
    for w, b in zip(weights, biases):
        wT = jnp.asarray(w, jnp.float32).T                 # (d_out, d_in)
        b2 = jnp.asarray(b, jnp.float32).reshape(-1, 1)    # (d_out, 1)
        in_specs.append(pl.BlockSpec(wT.shape, lambda i, bias_ref: (0, 0)))
        in_specs.append(pl.BlockSpec(b2.shape, lambda i, bias_ref: (0, 0)))
        flat_wb.extend([wT, b2])

    dims = [int(w.shape[0]) for w in weights] + [out_dim]
    flops = 2 * N_pad * sum(dims[i] * dims[i + 1] for i in range(len(dims) - 1))
    param_bytes = 4 * sum(int(w.size) + int(b.size) for w, b in zip(weights, biases))
    cost = pl.CostEstimate(
        flops=flops,
        transcendentals=4 * L * N_pad,
        bytes_accessed=4 * out_dim * N_pad + param_bytes,   # memory-bound: I/O >> flops util
    )

    out_t = pl.pallas_call(
        _make_inr_kernel(H, W, L, n_layers, tile_n),
        out_shape=jax.ShapeDtypeStruct((out_dim, N_pad), jnp.float32),
        grid_spec=pltpu.PrefetchScalarGridSpec(
            num_scalar_prefetch=1,                          # runtime `bias` scalar in SMEM
            grid=(N_pad // tile_n,),
            in_specs=in_specs,
            out_specs=pl.BlockSpec((out_dim, tile_n), lambda i, bias_ref: (0, i)),
        ),
        compiler_params=pltpu.CompilerParams(dimension_semantics=("parallel",)),
        cost_estimate=cost,
    )(bias_arr, *flat_wb)

    # Lane-dense (out_dim, N_pad) slab -> (N, out_dim) to match the module's output.
    return out_t[:, :N].T


# ----------------------------------------------------------------------------
# Pure-JAX reference (mirrors the PyTorch math) for correctness checks.
# ----------------------------------------------------------------------------
def make_coords(H, W, bias):
    grids = []
    for item in (H, W):
        lo, hi = -1.0, 1.0
        r = (hi - lo) / (2 * item)
        g = lo + r + 2.0 * r * jnp.arange(item, dtype=jnp.float32)
        g = g + (r / 100.0) * bias
        grids.append(g)
    gh, gw = jnp.meshgrid(grids[0], grids[1], indexing="ij")
    return jnp.stack([gh, gw], axis=-1).reshape(-1, 2)      # (H*W, 2)


def input_mapping(coord, L):
    feats = [coord]
    for j in range(L):
        f = (2.0 ** j) * jnp.pi
        feats.append(jnp.sin(f * coord))
        feats.append(jnp.cos(f * coord))
    return jnp.concatenate(feats, axis=-1)                  # (N, 4L+2)


def _mlp_ref(enc, weights, biases):
    h = enc
    for i, (w, b) in enumerate(zip(weights, biases)):
        h = h @ w + b
        if i < len(weights) - 1:
            h = jnp.maximum(h, 0.0)
    return h


def _ref_forward(x, bias, weights, biases, L):
    H, W = x.shape[-2], x.shape[-1]
    return _mlp_ref(input_mapping(make_coords(H, W, bias), L), weights, biases)


if __name__ == "__main__":
    # args: input_mappings=2 -> in_dim=10, output_channel=4, hidden_list=[32,32], ReLU
    B, C, H, W = 2, 4, 16, 16
    L = 2
    hidden_list = [32, 32]
    out_ch = 4
    in_dim = 4 * L + 2

    key = jax.random.PRNGKey(0)
    kx, kp = jax.random.split(key)
    x = jax.random.normal(kx, (B, C, H, W), dtype=jnp.float32)
    bias = jnp.float32(0.5)

    # Deterministic parameter init (torch.nn.Linear-style uniform bounds).
    dims = [in_dim] + hidden_list + [out_ch]
    weights, biases = [], []
    k = kp
    for i in range(len(dims) - 1):
        k, kw, kb = jax.random.split(k, 3)
        bound = 1.0 / (dims[i] ** 0.5)
        weights.append(jax.random.uniform(kw, (dims[i], dims[i + 1]),
                                          jnp.float32, -bound, bound))
        biases.append(jax.random.uniform(kb, (dims[i + 1],),
                                         jnp.float32, -bound, bound))

    # --- main check (N is a multiple of the tile) ---
    out = jax.block_until_ready(inr_forward(x, bias, weights, biases, L))
    assert out.shape == (H * W, out_ch), out.shape
    ref = _ref_forward(x, bias, weights, biases, L)
    assert jnp.allclose(out, ref, atol=2e-4, rtol=2e-4)

    # --- padding path check (H*W not a multiple of 128) ---
    x2 = jnp.zeros((1, 1, 10, 12), dtype=jnp.float32)
    out2 = jax.block_until_ready(inr_forward(x2, bias, weights, biases, L))
    assert out2.shape == (10 * 12, out_ch), out2.shape
    ref2 = _ref_forward(x2, bias, weights, biases, L)
    assert jnp.allclose(out2, ref2, atol=2e-4, rtol=2e-4)

    print("KERNEL_OK")
</pallas_src>

<mosaic_0001>
module attributes {stable_mosaic.version = 11 : i64} {
  func.func @kernel(%arg0: i32, %arg1: memref<1xf32, #tpu.memory_space<smem>>, %arg2: memref<32x10xf32, #tpu.memory_space<vmem>>, %arg3: memref<32x1xf32, #tpu.memory_space<vmem>>, %arg4: memref<32x32xf32, #tpu.memory_space<vmem>>, %arg5: memref<32x1xf32, #tpu.memory_space<vmem>>, %arg6: memref<4x32xf32, #tpu.memory_space<vmem>>, %arg7: memref<4x1xf32, #tpu.memory_space<vmem>>, %arg8: memref<4x128xf32, #tpu.memory_space<vmem>>) attributes {dimension_semantics = [#tpu.dimension_semantics<parallel>], iteration_bounds = array<i64: 2>, scalar_prefetch = 1 : i64, scratch_operands = 0 : i64, tpu.core_type = #tpu.core_type<tc>, window_params = [{pipeline_mode = #tpu.pipeline_mode<synchronous>, transform_indices = @transform_0, window_bounds = array<i64: 32, 10>}, {pipeline_mode = #tpu.pipeline_mode<synchronous>, transform_indices = @transform_1, window_bounds = array<i64: 32, 1>}, {pipeline_mode = #tpu.pipeline_mode<synchronous>, transform_indices = @transform_2, window_bounds = array<i64: 32, 32>}, {pipeline_mode = #tpu.pipeline_mode<synchronous>, transform_indices = @transform_3, window_bounds = array<i64: 32, 1>}, {pipeline_mode = #tpu.pipeline_mode<synchronous>, transform_indices = @transform_4, window_bounds = array<i64: 4, 32>}, {pipeline_mode = #tpu.pipeline_mode<synchronous>, transform_indices = @transform_5, window_bounds = array<i64: 4, 1>}, {transform_indices = @transform_6, window_bounds = array<i64: 4, 128>}]} {
    %c0 = arith.constant 0 : index
    %0 = memref.load %arg1[%c0] : memref<1xf32, #tpu.memory_space<smem>>
    %1 = tpu.iota {dimensions = array<i32: 1>} : vector<1x128xi32>
    %c128_i32 = arith.constant 128 : i32
    %2 = arith.muli %arg0, %c128_i32 : i32
    %3 = vector.broadcast %2 : i32 to vector<1x128xi32>
    %4 = arith.addi %1, %3 : vector<1x128xi32>
    %5 = arith.sitofp %4 : vector<1x128xi32> to vector<1x128xf32>
    %cst = arith.constant 5.000000e-01 : f32
    %6 = vector.broadcast %cst : f32 to vector<1x128xf32>
    %7 = arith.addf %5, %6 : vector<1x128xf32>
    %cst_0 = arith.constant 6.250000e-02 : f32
    %8 = vector.broadcast %cst_0 : f32 to vector<1x128xf32>
    %9 = arith.mulf %7, %8 : vector<1x128xf32>
    %10 = math.floor %9 : vector<1x128xf32>
    %11 = arith.fptosi %10 : vector<1x128xf32> to vector<1x128xi32>
    %c16_i32 = arith.constant 16 : i32
    %12 = vector.broadcast %c16_i32 : i32 to vector<1x128xi32>
    %13 = arith.muli %11, %12 : vector<1x128xi32>
    %14 = arith.subi %4, %13 : vector<1x128xi32>
    %c0_i32 = arith.constant 0 : i32
    %15 = vector.broadcast %c0_i32 : i32 to vector<1x128xi32>
    %16 = arith.cmpi slt, %14, %15 : vector<1x128xi32>
    %c1_i32 = arith.constant 1 : i32
    %17 = vector.broadcast %c1_i32 : i32 to vector<1x128xi32>
    %18 = arith.subi %11, %17 : vector<1x128xi32>
    %c16_i32_1 = arith.constant 16 : i32
    %19 = vector.broadcast %c16_i32_1 : i32 to vector<1x128xi32>
    %20 = arith.cmpi sge, %14, %19 : vector<1x128xi32>
    %c1_i32_2 = arith.constant 1 : i32
    %21 = vector.broadcast %c1_i32_2 : i32 to vector<1x128xi32>
    %22 = arith.addi %11, %21 : vector<1x128xi32>
    %23 = arith.select %20, %22, %11 : vector<1x128xi1>, vector<1x128xi32>
    %24 = arith.select %16, %18, %23 : vector<1x128xi1>, vector<1x128xi32>
    %c0_i32_3 = arith.constant 0 : i32
    %25 = vector.broadcast %c0_i32_3 : i32 to vector<1x128xi32>
    %26 = arith.cmpi slt, %14, %25 : vector<1x128xi32>
    %c16_i32_4 = arith.constant 16 : i32
    %27 = vector.broadcast %c16_i32_4 : i32 to vector<1x128xi32>
    %28 = arith.addi %14, %27 : vector<1x128xi32>
    %c16_i32_5 = arith.constant 16 : i32
    %29 = vector.broadcast %c16_i32_5 : i32 to vector<1x128xi32>
    %30 = arith.cmpi sge, %14, %29 : vector<1x128xi32>
    %c16_i32_6 = arith.constant 16 : i32
    %31 = vector.broadcast %c16_i32_6 : i32 to vector<1x128xi32>
    %32 = arith.subi %14, %31 : vector<1x128xi32>
    %33 = arith.select %30, %32, %14 : vector<1x128xi1>, vector<1x128xi32>
    %34 = arith.select %26, %28, %33 : vector<1x128xi1>, vector<1x128xi32>
    %35 = arith.sitofp %24 : vector<1x128xi32> to vector<1x128xf32>
    %cst_7 = arith.constant 1.250000e-01 : f32
    %36 = vector.broadcast %cst_7 : f32 to vector<1x128xf32>
    %37 = arith.mulf %36, %35 : vector<1x128xf32>
    %cst_8 = arith.constant -9.375000e-01 : f32
    %38 = vector.broadcast %cst_8 : f32 to vector<1x128xf32>
    %39 = arith.addf %38, %37 : vector<1x128xf32>
    %cst_9 = arith.constant 6.250000e-04 : f32
    %40 = arith.mulf %cst_9, %0 : f32
    %41 = vector.broadcast %40 : f32 to vector<1x128xf32>
    %42 = arith.addf %39, %41 : vector<1x128xf32>
    %43 = arith.sitofp %34 : vector<1x128xi32> to vector<1x128xf32>
    %cst_10 = arith.constant 1.250000e-01 : f32
    %44 = vector.broadcast %cst_10 : f32 to vector<1x128xf32>
    %45 = arith.mulf %44, %43 : vector<1x128xf32>
    %cst_11 = arith.constant -9.375000e-01 : f32
    %46 = vector.broadcast %cst_11 : f32 to vector<1x128xf32>
    %47 = arith.addf %46, %45 : vector<1x128xf32>
    %cst_12 = arith.constant 6.250000e-04 : f32
    %48 = arith.mulf %cst_12, %0 : f32
    %49 = vector.broadcast %48 : f32 to vector<1x128xf32>
    %50 = arith.addf %47, %49 : vector<1x128xf32>
    %51 = tpu.concatenate %42, %50 in 0 : vector<1x128xf32>, vector<1x128xf32> -> vector<2x128xf32>
    %cst_13 = arith.constant 3.14159274 : f32
    %52 = vector.broadcast %cst_13 : f32 to vector<2x128xf32>
    %53 = arith.mulf %52, %51 : vector<2x128xf32>
    %54 = math.sin %53 : vector<2x128xf32>
    %cst_14 = arith.constant 3.14159274 : f32
    %55 = vector.broadcast %cst_14 : f32 to vector<2x128xf32>
    %56 = arith.mulf %55, %51 : vector<2x128xf32>
    %57 = math.cos %56 : vector<2x128xf32>
    %cst_15 = arith.constant 6.28318548 : f32
    %58 = vector.broadcast %cst_15 : f32 to vector<2x128xf32>
    %59 = arith.mulf %58, %51 : vector<2x128xf32>
    %60 = math.sin %59 : vector<2x128xf32>
    %cst_16 = arith.constant 6.28318548 : f32
    %61 = vector.broadcast %cst_16 : f32 to vector<2x128xf32>
    %62 = arith.mulf %61, %51 : vector<2x128xf32>
    %63 = math.cos %62 : vector<2x128xf32>
    %64 = tpu.concatenate %51, %54, %57, %60, %63 in 0 : vector<2x128xf32>, vector<2x128xf32>, vector<2x128xf32>, vector<2x128xf32>, vector<2x128xf32> -> vector<10x128xf32>
    %c0_17 = arith.constant 0 : index
    %c0_18 = arith.constant 0 : index
    %65 = vector.load %arg2[%c0_17, %c0_18] : memref<32x10xf32, #tpu.memory_space<vmem>>, vector<32x10xf32>
    %c0_19 = arith.constant 0 : index
    %c0_20 = arith.constant 0 : index
    %66 = vector.load %arg3[%c0_19, %c0_20] : memref<32x1xf32, #tpu.memory_space<vmem>>, vector<32x1xf32>
    %cst_21 = arith.constant dense<0.000000e+00> : vector<32x128xf32>
    %67 = tpu.matmul %65, %64, %cst_21 {dimension_numbers = #tpu.dot_dimension_numbers<[1], [0], [0], [1], [0, 0, 1, 1], [], []>} : vector<32x10xf32>, vector<10x128xf32>, vector<32x128xf32> -> vector<32x128xf32>
    %68 = vector.broadcast %66 : vector<32x1xf32> to vector<32x128xf32>
    %69 = arith.addf %67, %68 : vector<32x128xf32>
    %cst_22 = arith.constant 0.000000e+00 : f32
    %70 = vector.broadcast %cst_22 : f32 to vector<32x128xf32>
    %71 = arith.maximumf %69, %70 : vector<32x128xf32>
    %c0_23 = arith.constant 0 : index
    %c0_24 = arith.constant 0 : index
    %72 = vector.load %arg4[%c0_23, %c0_24] : memref<32x32xf32, #tpu.memory_space<vmem>>, vector<32x32xf32>
    %c0_25 = arith.constant 0 : index
    %c0_26 = arith.constant 0 : index
    %73 = vector.load %arg5[%c0_25, %c0_26] : memref<32x1xf32, #tpu.memory_space<vmem>>, vector<32x1xf32>
    %cst_27 = arith.constant dense<0.000000e+00> : vector<32x128xf32>
    %74 = tpu.matmul %72, %71, %cst_27 {dimension_numbers = #tpu.dot_dimension_numbers<[1], [0], [0], [1], [0, 0, 1, 1], [], []>} : vector<32x32xf32>, vector<32x128xf32>, vector<32x128xf32> -> vector<32x128xf32>
    %75 = vector.broadcast %73 : vector<32x1xf32> to vector<32x128xf32>
    %76 = arith.addf %74, %75 : vector<32x128xf32>
    %cst_28 = arith.constant 0.000000e+00 : f32
    %77 = vector.broadcast %cst_28 : f32 to vector<32x128xf32>
    %78 = arith.maximumf %76, %77 : vector<32x128xf32>
    %c0_29 = arith.constant 0 : index
    %c0_30 = arith.constant 0 : index
    %79 = vector.load %arg6[%c0_29, %c0_30] : memref<4x32xf32, #tpu.memory_space<vmem>>, vector<4x32xf32>
    %c0_31 = arith.constant 0 : index
    %c0_32 = arith.constant 0 : index
    %80 = vector.load %arg7[%c0_31, %c0_32] : memref<4x1xf32, #tpu.memory_space<vmem>>, vector<4x1xf32>
    %cst_33 = arith.constant dense<0.000000e+00> : vector<4x128xf32>
    %81 = tpu.matmul %79, %78, %cst_33 {dimension_numbers = #tpu.dot_dimension_numbers<[1], [0], [0], [1], [0, 0, 1, 1], [], []>} : vector<4x32xf32>, vector<32x128xf32>, vector<4x128xf32> -> vector<4x128xf32>
    %82 = vector.broadcast %80 : vector<4x1xf32> to vector<4x128xf32>
    %83 = arith.addf %81, %82 : vector<4x128xf32>
    %c0_34 = arith.constant 0 : index
    %c0_35 = arith.constant 0 : index
    %84 = vector.load %arg8[%c0_34, %c0_35] : memref<4x128xf32, #tpu.memory_space<vmem>>, vector<4x128xf32>
    tpu.vector_store %arg8[%c0_34, %c0_35], %83 {strides = array<i32>} : memref<4x128xf32, #tpu.memory_space<vmem>>, vector<4x128xf32>,
    return
  }
  func.func @transform_0(%arg0: i32, %arg1: memref<1xf32, #tpu.memory_space<smem>>) -> (i32, i32) {
    %c0_i32 = arith.constant 0 : i32
    %c0_i32_0 = arith.constant 0 : i32
    %c0_i32_1 = arith.constant 0 : i32
    return %c0_i32, %c0_i32_0 : i32, i32
  }
  func.func @transform_1(%arg0: i32, %arg1: memref<1xf32, #tpu.memory_space<smem>>) -> (i32, i32) {
    %c0_i32 = arith.constant 0 : i32
    %c0_i32_0 = arith.constant 0 : i32
    %c0_i32_1 = arith.constant 0 : i32
    return %c0_i32, %c0_i32_0 : i32, i32
  }
  func.func @transform_2(%arg0: i32, %arg1: memref<1xf32, #tpu.memory_space<smem>>) -> (i32, i32) {
    %c0_i32 = arith.constant 0 : i32
    %c0_i32_0 = arith.constant 0 : i32
    %c0_i32_1 = arith.constant 0 : i32
    return %c0_i32, %c0_i32_0 : i32, i32
  }
  func.func @transform_3(%arg0: i32, %arg1: memref<1xf32, #tpu.memory_space<smem>>) -> (i32, i32) {
    %c0_i32 = arith.constant 0 : i32
    %c0_i32_0 = arith.constant 0 : i32
    %c0_i32_1 = arith.constant 0 : i32
    return %c0_i32, %c0_i32_0 : i32, i32
  }
  func.func @transform_4(%arg0: i32, %arg1: memref<1xf32, #tpu.memory_space<smem>>) -> (i32, i32) {
    %c0_i32 = arith.constant 0 : i32
    %c0_i32_0 = arith.constant 0 : i32
    %c0_i32_1 = arith.constant 0 : i32
    return %c0_i32, %c0_i32_0 : i32, i32
  }
  func.func @transform_5(%arg0: i32, %arg1: memref<1xf32, #tpu.memory_space<smem>>) -> (i32, i32) {
    %c0_i32 = arith.constant 0 : i32
    %c0_i32_0 = arith.constant 0 : i32
    %c0_i32_1 = arith.constant 0 : i32
    return %c0_i32, %c0_i32_0 : i32, i32
  }
  func.func @transform_6(%arg0: i32, %arg1: memref<1xf32, #tpu.memory_space<smem>>) -> (i32, i32) {
    %c0_i32 = arith.constant 0 : i32
    %c0_i32_0 = arith.constant 0 : i32
    return %c0_i32, %arg0 : i32, i32
  }
}

</mosaic_0001>

<bundles_post_ra>
// kernel: tpu_custom_call.1
= control target key start
LH: loop header
LB: loop body
LE: loop exit
PB: predicated region body
PF: predicated region fallthrough
CT: control target
= control target key end

     0   :  { %s1610_s0 = inlined_call_operand.<no memory space> [shape: f32[1], index: 0, kind: input, shape index: {}]   ;;  %s1611_s1 = inlined_call_operand.vmem [shape: f32[32,10], index: 1, kind: input, shape index: {}]   ;;  %s1612_s2 = inlined_call_operand.vmem [shape: f32[32,1], index: 2, kind: input, shape index: {}]   ;;  %s1613_s3 = inlined_call_operand.vmem [shape: f32[32,32], index: 3, kind: input, shape index: {}]   ;;  %s1614_s4 = inlined_call_operand.vmem [shape: f32[32,1], index: 4, kind: input, shape index: {}]   ;;  %s1615_s5 = inlined_call_operand.vmem [shape: f32[4,32], index: 5, kind: input, shape index: {}]   ;;  %s1616_s6 = inlined_call_operand.vmem [shape: f32[4,1], index: 6, kind: input, shape index: {}]   ;;  %s1617_s7 = inlined_call_operand.hbm [shape: f32[4,256], index: 7, kind: output, shape index: {}]  }
   0x1   :  { %12 = sst [smem:[#allocation3]] %s1610_s0 }
   0x2   :  { %13 = vsyncpa [#allocation5], 0 }
   0x3   :  { %15 = vsyncpa [#allocation5 + $0x1], 0  ;;  %s1377_s26 = smov 0   ;;  %s1379_s27 = smov 0  }
   0x4   :  { %s1381_s28 = smov 0   ;;  %s1383_s29 = smov 0  }
   0x5 LB: > { %s1398_s0 = sadd.s32 4294967295, %s1322_s29   ;;  %s1103_s30 = sadd.s32 4294967294, %s1322_s29   ;;  %s1322_s29 = sphi %s1383_s29, %s1623_s29   ;;  %s1318_s28 = sphi %s1381_s28, %s1622_s28   ;;  %s1314_s27 = sphi %s1379_s27, %s1621_s27   ;;  %s1310_s26 = sphi %s1377_s26, %s1620_s26  }
   0x6   : > { %s1402_s8 = sadd.s32 1, %s1322_s29   ;;  %s154_s9 = sadd.s32 1, %s1318_s28 }
   0x7   : > { %s151_s10 = ssub.s32 %s1322_s29, %s1402_s8  ;;  %p164_p0 = scmp.ne.s32.totalorder %s1318_s28, %s1314_s27 }
   0x8   : > { %p152_p1 = scmp.eq.s32.totalorder %s151_s10, 0  ;;  %p165_p2 = scmp.eq.s32.totalorder %s1398_s0, 1 }
   0x9   : > { %p170_p3 = scmp.ne.s32.totalorder %s1314_s27, %s1310_s26  ;;  %p171_p4 = scmp.eq.s32.totalorder %s1103_s30, 1 }
   0xa   : > { %s1413_s11 = scalar_select %p152_p1, %s1318_s28, %s154_s9  }
   0xb   : > { %p1415_p5 = por %p165_p2, %p164_p0  ;;  %p1419_p6 = por %p171_p4, %p170_p3 }
   0xc   : > { %p1105_p7 = scmp.ge.s32.totalorder %s1322_s29, 1  ;;  %p207_p8 = scmp.lt.s32.totalorder %s1322_s29, 3 }
   0xe   : > { %p208_p9 = pnand %p1105_p7, %p207_p8 }
   0xf   : > { %s1107_s14 = sshll.u32 (!%p208_p9), %s1398_s0, 7  ;;  %s1442_s25 = sld [smem:[#allocation3]] (!%p208_p9) }
  0x10   : > { %211 = sbr.rel (%p208_p9) target bundleno = 780 (0x30c), region = 44  ;;  %s229_s23 = sand.u32 (!%p208_p9), 1, %s1314_s27  }
  0x11   : > { %s1106_s24 = sshll.u32 (!%p208_p9), %s229_s23, 2  ;;  %s1043_s16 = scalar_lea.sflag (!%p208_p9), [#allocation5], %s229_s23 }
  0x12   : > { %s231_s30 = scalar_lea.vmem (!%p208_p9), [#allocation4], %s1106_s24 }
  0x13   : > { %s1056_s9 = sshll.u32 (!%p208_p9), %s231_s30, 4  ;;  %s1057_s9 = int_to_ptr.vmem [resolvable:$true] %s1056_s9 }
  0x14   : > { %s1262_s17 = scalar_lea.vmem (!%p208_p9), %s1057_s9, 64 }
  0x15   : > { %v233_v0 = vlaneseq  ;;  %v236_v1 = vstv %s1107_s14  ;;  %v698_v5 = vld [vmem:[%s1611_s1] sm:$0xff]  ;;  %vm726_vm0 = vcmask 80896   ;;  %v705_v9 = vld [vmem:[%s1612_s2 + $0x18] sm:$0xff]  ;;  %v1324_v10 = vmov 0   ;;  %v703_v11 = vld [vmem:[%s1612_s2 + $0x8] sm:$0xff]  ;;  %p1263_p10 = scmp.ne.s32.totalorder %s1057_s9, %s1262_s17 }
  0x16   : > { %1163 = vmatprep.mubr.msk.f32.mxu0 %vm726_vm0, %v698_v5  ;;  %1252 = vset.pattern.permute.xlu0 %v1324_v10  ;;  %v704_v13 = vld [vmem:[%s1612_s2 + $0x10] sm:$0xff]  ;;  %v702_v14 = vld [vmem:[%s1612_s2] sm:$0xff]  ;;  %v838_v18 = vld [vmem:[%s1614_s4 + $0x18] sm:$0xff]  ;;  %s258_s19 = smul.f32 0.000625, %s1442_s25  ;;  %vm265_vm3 = vcmask 1040384  }
  0x17   : > { %v234_v2 = vand.u32 127, %v233_v0  ;;  %1253 = vset.pattern.permute.xlu1 %v1324_v10  ;;  %723 = vperm.xlu0 %1252, %v705_v9   ;;  %v837_v19 = vld [vmem:[%s1614_s4 + $0x10] sm:$0xff]  ;;  %v836_v25 = vld [vmem:[%s1614_s4 + $0x8] sm:$0xff]  ;;  %v835_v26 = vld [vmem:[%s1614_s4] sm:$0xff]  ;;  %v1327_v5 = vmov 2131351028   ;;  %p1264_p11 = pnand %p1263_p10, %p1415_p5 }
  0x18   : > { %713 = vperm.xlu1 %1253, %v703_v11   ;;  %v962_v33 = vld [vmem:[%s1616_s6] sm:$0xf]  ;;  %v259_v34 = vstv %s258_s19  ;;  %v1329_v9 = vmov 920167782   ;;  %s1137_s25 = sshll.u32 %s1398_s0, 6  ;;  %s1333_s0 = smov [#allocation4]  }
  0x19   : > { %v237_v3 = vadd.s32 %v236_v1, %v234_v2  ;;  %v1325_v1 = vmov 683565275   ;;  %s1575_s15 = scalar_lea.hbm %s1617_s7, %s1137_s25  ;;  %p1265_p12 = pneg %p1264_p11 }
  0x1a   : > { %s1266_s18 = sshll.u32 %s1333_s0, 4  ;;  %s1267_s18 = int_to_ptr.vmem [resolvable:$false] %s1266_s18 }
  0x1b   : > { %v238_v4 = vcvt.s32.f32 %v237_v3  ;;  %718 = vperm.xlu0 %1252, %v704_v13   ;;  %s1268_s19 = scalar_lea.vmem %s1267_s18, 128  ;;  %p1269_p13 = scmp.lt.s32.totalorder %s1057_s9, %s1267_s18 }
  0x1c   : > { %708 = vperm.xlu1 %1253, %v702_v14   ;;  %p1270_p0 = scmp.lt.s32.totalorder %s1268_s19, %s1262_s17 }
  0x1d   : > { %v239_v6 = vadd.f32 0.5, %v238_v4 }
  0x1e   : > { %p1271_p1 = por %p1270_p0, %p1269_p13 }
  0x1f   : > { %v240_v7 = vmul.f32 0.0625, %v239_v6  ;;  %856 = vperm.xlu0 %1252, %v838_v18  }
  0x20   : > { %851 = vperm.xlu1 %1253, %v837_v19   ;;  %p1272_p2 = pnand %p1271_p1, %p1265_p12 }
  0x21   : > { %v241_v8 = vfloor.f32 %v240_v7  ;;  %v1328_v7 = vmov 2102212464  }
  0x23   : > { %v1194_v12 = vtrunc.f32 %v241_v8  ;;  %846 = vperm.xlu0 %1252, %v836_v25  }
  0x24   : > { %841 = vperm.xlu1 %1253, %v835_v26  }
  0x25   : > { %v1195_v15 = vcvt.f32.s32 %v1194_v12 }
  0x27   : > { %v243_v16 = vmul.u32 16, %v1195_v15  ;;  %v248_v17 = vadd.s32 1, %v1195_v15  ;;  %v1108_v21 = vadd.s32 4294967295, %v1195_v15  ;;  %965 = vperm.xlu0 %1252, %v962_v33  }
  0x29   : > { %v244_v20 = vsub.s32 %v237_v3, %v243_v16  ;;  %v1326_v3 = vmov 2475754826  }
  0x2b   : > { %vm245_vm1 = vcmp.lt.s32.totalorder %v244_v20, 0  ;;  %vm247_vm2 = vcmp.ge.s32.totalorder %v244_v20, 16  ;;  %v251_v22 = vadd.s32 16, %v244_v20  ;;  %v1109_v23 = vadd.s32 4294967280, %v244_v20 }
  0x2c   : > { %v249_v24 = vsel %vm247_vm2, %v248_v17, %v1195_v15  ;;  %v1330_v17 = vmov 1326507024  }
  0x2d   : > { %v250_v27 = vsel %vm245_vm1, %v1108_v21, %v249_v24  ;;  %v253_v28 = vsel %vm247_vm2, %v1109_v23, %v244_v20 }
  0x2e   : > { %v254_v29 = vsel %vm245_vm1, %v251_v22, %v253_v28  ;;  %v255_v30 = vcvt.s32.f32 %v250_v27 }
  0x2f   : > { %v261_v31 = vcvt.s32.f32 %v254_v29 }
  0x30   : > { %v256_v32 = vmul.f32 0.125, %v255_v30 }
  0x31   : > { %v262_v35 = vmul.f32 0.125, %v261_v31 }
  0x32   : > { %v257_v36 = vadd.f32 -0.9375, %v256_v32 }
  0x33   : > { %v263_v37 = vadd.f32 -0.9375, %v262_v35 }
  0x34   : > { %v260_v38 = vadd.f32 %v259_v34, %v257_v36 }
  0x35   : > { %v264_v39 = vadd.f32 %v263_v37, %v259_v34 }
  0x37   : > { %v1460_v40 = vsel %vm265_vm3, %v260_v38, %v264_v39 }
  0x38   : > { %v1463_v41 = vmul.f32 3.1415927, %v1460_v40  ;;  %v1466_v42 = vmul.f32 6.2831855, %v1460_v40 }
  0x3a   : > { %v268_v43 = vand.u32 2147483647, %v1463_v41  ;;  %v271_v44 = vand.u32 2139095040, %v1463_v41  ;;  %v476_v45 = vand.u32 2147483647, %v1466_v42  ;;  %v479_v46 = vand.u32 2139095040, %v1466_v42 }
  0x3b   : > { %vm270_vm3 = vcmp.lt.s32.totalorder %v1463_v41, 0 }
  0x3c   : > { %v272_v47 = vshrl.u32 %v271_v44, 23  ;;  %v275_v48 = vand.u32 8388607, %v268_v43  ;;  %v480_v49 = vshrl.u32 %v479_v46, 23  ;;  %v483_v50 = vand.u32 8388607, %v476_v45 }
  0x3e   : > { %v1110_v51 = vadd.s32 4294967169, %v272_v47  ;;  %v1118_v52 = vadd.s32 4294967169, %v480_v49  ;;  %v276_v54 = vor.u32 8388608, %v275_v48  ;;  %v484_v55 = vor.u32 8388608, %v483_v50 }
  0x40   : > { %v278_v53 = vadd.s32 1, %v1110_v51  ;;  %v486_v56 = vadd.s32 1, %v1118_v52  ;;  %v1476_v61 = vshll.u32 %v276_v54, 8  ;;  %v1478_v63 = vshll.u32 %v484_v55, 8 }
  0x42   : > { %vm279_vm4 = vcmp.gt.s32.totalorder %v278_v53, 0  ;;  %vm487_vm5 = vcmp.gt.s32.totalorder %v486_v56, 0 }
  0x43   : > { %v280_v57 = vsel %vm279_vm4, %v278_v53, 0  ;;  %v488_v60 = vsel %vm487_vm5, %v486_v56, 0  ;;  %vm269_vm4 = vcmp.le.f32.partialorder %v268_v43, 0.7853982  ;;  %vm478_vm5 = vcmp.lt.s32.totalorder %v1466_v42, 0 }
  0x44   : > { %v281_v58 = vshrl.u32 %v280_v57, 5  ;;  %v282_v59 = vand.u32 31, %v280_v57  ;;  %v490_v62 = vand.u32 31, %v488_v60  ;;  %v1480_v11 = vshrl.u32 %v488_v60, 5 }
  0x46   : > { %v283_v0 = vsub.s32 32, %v282_v59  ;;  %v285_v2 = vshll.u32 %v1325_v1, %v282_v59  ;;  %v288_v4 = vshll.u32 %v1326_v3, %v282_v59  ;;  %v291_v6 = vshll.u32 %v1327_v5, %v282_v59 }
  0x47   : > { %v294_v8 = vshll.u32 %v1328_v7, %v282_v59  ;;  %v297_v10 = vshll.u32 %v1329_v9, %v282_v59  ;;  %vm300_vm6 = vcmp.lt.s32.totalorder %v281_v58, 1  ;;  %vm301_vm7 = vcmp.lt.s32.totalorder %v281_v58, 2 }
  0x48   : > { %v284_v12 = vshrl.u32 %v1325_v1, %v283_v0  ;;  %v286_v13 = vshrl.u32 %v1326_v3, %v283_v0  ;;  %v289_v14 = vshrl.u32 %v1327_v5, %v283_v0  ;;  %v292_v15 = vshrl.u32 %v1328_v7, %v283_v0 }
  0x49   : > { %v295_v16 = vshrl.u32 %v1329_v9, %v283_v0  ;;  %v298_v18 = vshrl.u32 %v1330_v17, %v283_v0  ;;  %vm303_vm8 = vcmp.lt.s32.totalorder %v281_v58, 4  ;;  %v491_v22 = vsub.s32 32, %v490_v62 }
  0x4a   : > { %v287_v19 = vor.u32 %v286_v13, %v285_v2  ;;  %v290_v20 = vor.u32 %v289_v14, %v288_v4  ;;  %v293_v21 = vor.u32 %v292_v15, %v291_v6  ;;  %vm302_vm9 = vcmp.lt.s32.totalorder %v281_v58, 3 }
  0x4b   : > { %v296_v23 = vor.u32 %v295_v16, %v294_v8  ;;  %v299_v24 = vor.u32 %v298_v18, %v297_v10  ;;  %v493_v25 = vshll.u32 %v1325_v1, %v490_v62  ;;  %v496_v33 = vshll.u32 %v1326_v3, %v490_v62 }
  0x4c   : > { %v304_v26 = vsel %vm300_vm6, %v284_v12, %v287_v19  ;;  %v305_v27 = vsel %vm303_vm8, %v293_v21, 2102212464  ;;  %v308_v28 = vsel %vm300_vm6, %v287_v19, %v290_v20  ;;  %v312_v29 = vsel %vm300_vm6, %v290_v20, %v293_v21 }
  0x4d   : > { %v306_v30 = vsel %vm302_vm9, %v290_v20, %v305_v27  ;;  %v309_v31 = vsel %vm303_vm8, %v296_v23, 920167782  ;;  %v313_v32 = vsel %vm303_vm8, %v299_v24, 1326507024  ;;  %v492_v36 = vshrl.u32 %v1325_v1, %v491_v22 }
  0x4e   : > { %v310_v34 = vsel %vm302_vm9, %v293_v21, %v309_v31  ;;  %v314_v35 = vsel %vm302_vm9, %v296_v23, %v313_v32  ;;  %v494_v37 = vshrl.u32 %v1326_v3, %v491_v22  ;;  %v307_v38 = vsel %vm301_vm7, %v304_v26, %v306_v30 }
  0x4f   : > { %v311_v39 = vsel %vm301_vm7, %v308_v28, %v310_v34  ;;  %v315_v44 = vsel %vm301_vm7, %v312_v29, %v314_v35  ;;  %v497_v46 = vshrl.u32 %v1327_v5, %v491_v22  ;;  %v499_v53 = vshll.u32 %v1327_v5, %v490_v62 }
  0x50   : > { %v1489_v47 = vmul.u32.u64.low %v1476_v61, %v315_v44  ;;  %v1490_v48 = vmul.u32.u64.high %v1476_v61, %v315_v44, %v1489_v47  ;;  %v1493_v49 = vmul.u32.u64.low %v1476_v61, %v311_v39  ;;  %v1494_v50 = vmul.u32.u64.high %v1476_v61, %v311_v39, %v1493_v49 }
  0x51   : > { %v495_v51 = vor.u32 %v494_v37, %v493_v25  ;;  %v498_v52 = vor.u32 %v497_v46, %v496_v33  ;;  %v500_v54 = vshrl.u32 %v1328_v7, %v491_v22  ;;  %v502_v55 = vshll.u32 %v1328_v7, %v490_v62 }
  0x52   : > { %v503_v56 = vshrl.u32 %v1329_v9, %v491_v22  ;;  %v505_v57 = vshll.u32 %v1329_v9, %v490_v62  ;;  %v506_v59 = vshrl.u32 %v1330_v17, %v491_v22  ;;  %v323_v58 = vmul.u32 %v1476_v61, %v307_v38 }
  0x53   : > { %v501_v60 = vor.u32 %v500_v54, %v499_v53  ;;  %vm508_vm10 = vcmp.lt.s32.totalorder %v1480_v11, 1  ;;  %vm509_vm11 = vcmp.lt.s32.totalorder %v1480_v11, 2  ;;  %vm325_vm12 = vc.u32 %v1490_v48, %v1493_v49 }
  0x54   : > { %v326_v0 = vadd.s32 1, %v1494_v50  ;;  %v504_v1 = vor.u32 %v503_v56, %v502_v55  ;;  %vm510_vm13 = vcmp.lt.s32.totalorder %v1480_v11, 3  ;;  %v507_v2 = vor.u32 %v506_v59, %v505_v57 }
  0x55   : > { %vm511_vm14 = vcmp.lt.s32.totalorder %v1480_v11, 4  ;;  %v512_v3 = vsel %vm508_vm10, %v492_v36, %v495_v51  ;;  %v516_v62 = vsel %vm508_vm10, %v495_v51, %v498_v52  ;;  %v520_v6 = vsel %vm508_vm10, %v498_v52, %v501_v60 }
  0x56   : > { %v327_v4 = vsel %vm325_vm12, %v326_v0, %v1494_v50  ;;  %v513_v61 = vsel %vm511_vm14, %v501_v60, 2102212464  ;;  %v517_v5 = vsel %vm511_vm14, %v504_v1, 920167782  ;;  %v521_v10 = vsel %vm511_vm14, %v507_v2, 1326507024 }
  0x57   : > { %v328_v7 = vadd.s32 %v327_v4, %v323_v58  ;;  %v514_v8 = vsel %vm510_vm13, %v498_v52, %v513_v61  ;;  %v518_v9 = vsel %vm510_vm13, %v501_v60, %v517_v5  ;;  %v522_v14 = vsel %vm510_vm13, %v504_v1, %v521_v10 }
  0x58   : > { %v515_v12 = vsel %vm509_vm11, %v512_v3, %v514_v8  ;;  %v519_v13 = vsel %vm509_vm11, %v516_v62, %v518_v9  ;;  %v523_v16 = vsel %vm509_vm11, %v520_v6, %v522_v14  ;;  %v324_v35 = vadd.s32 %v1493_v49, %v1490_v48 }
  0x59   : > { %v329_v15 = vadd.s32 536870912, %v328_v7  ;;  %v1511_v17 = vmul.u32.u64.low %v1478_v63, %v519_v13  ;;  %v1512_v18 = vmul.u32.u64.high %v1478_v63, %v519_v13, %v1511_v17  ;;  %v531_v22 = vmul.u32 %v1478_v63, %v515_v12 }
  0x5a   : > { %v1515_v19 = vmul.u32.u64.low %v1478_v63, %v523_v16  ;;  %v1516_v20 = vmul.u32.u64.high %v1478_v63, %v523_v16, %v1515_v19  ;;  %vm477_vm6 = vcmp.le.f32.partialorder %v476_v45, 0.7853982  ;;  %vm360_vm13 = vweird.f32 %v1463_v41 }
  0x5b   : > { %v330_v21 = vshrl.u32 %v329_v15, 30  ;;  %v534_v24 = vadd.s32 1, %v1512_v18 }
  0x5c   : > { %vm533_vm15 = vc.u32 %v1516_v20, %v1511_v17  ;;  %v532_v56 = vadd.s32 %v1511_v17, %v1516_v20 }
  0x5d   : > { %v331_v23 = vshll.u32 %v330_v21, 30  ;;  %v535_v11 = vsel %vm533_vm15, %v534_v24, %v1512_v18  ;;  %v354_v0 = vsub.s32 4, %v330_v21 }
  0x5e   : > { %v536_v26 = vadd.s32 %v535_v11, %v531_v22 }
  0x5f   : > { %v332_v25 = vsub.s32 %v328_v7, %v331_v23  ;;  %v355_v5 = vsel %vm270_vm3, %v354_v0, %v330_v21 }
  0x60   : > { %v537_v28 = vadd.s32 536870912, %v536_v26  ;;  %v357_v10 = vsel %vm269_vm4, 0, %v355_v5 }
  0x61   : > { %v334_v27 = vsub.s32 0, %v332_v25  ;;  %v361_v14 = vadd.s32 3, %v357_v10  ;;  %v465_v19 = vand.u32 3, %v357_v10  ;;  %v832_v10 = vld [vmem:[%s1613_s3 + $0x8] sm:$0xff] }
  0x62   : > { %v538_v30 = vshrl.u32 %v537_v28, 30 }
  0x63   : > { %v1111_v29 = vmin.u32 %v334_v27, %v332_v25  ;;  %v362_v18 = vand.u32 3, %v361_v14  ;;  %vm470_vm8 = vcmp.eq.s32.totalorder %v465_v19, 2  ;;  %vm467_vm10 = vcmp.eq.s32.totalorder %v465_v19, 0 }
  0x64   : > { %v539_v32 = vshll.u32 %v538_v30, 30  ;;  %v562_v13 = vsub.s32 4, %v538_v30  ;;  %vm466_vm12 = vcmp.lt.s32.totalorder %v465_v19, 2  ;;  %v1331_v14 = vmov 0.0  }
  0x65   : > { %v336_v31 = vclz %v1111_v29  ;;  %vm367_vm7 = vcmp.eq.s32.totalorder %v362_v18, 2  ;;  %vm364_vm9 = vcmp.eq.s32.totalorder %v362_v18, 0  ;;  %vm363_vm11 = vcmp.lt.s32.totalorder %v362_v18, 2 }
  0x66   : > { %v540_v34 = vsub.s32 %v536_v26, %v539_v32  ;;  %v563_v16 = vsel %vm478_vm5, %v562_v13, %v538_v30  ;;  %v834_v13 = vld [vmem:[%s1613_s3 + $0x18] sm:$0xff] }
  0x67   : > { %v1112_v33 = vadd.s32 4294967294, %v336_v31  ;;  %v565_v20 = vsel %vm477_vm6, 0, %v563_v16 }
  0x68   : > { %v542_v36 = vsub.s32 0, %v540_v34  ;;  %v569_v24 = vadd.s32 3, %v565_v20  ;;  %v673_v30 = vand.u32 3, %v565_v20 }
  0x69   : > { %vm1113_vm1 = vcmp.lt.s32.totalorder %v1112_v33, 0 }
  0x6a   : > { %v339_v63 = vsel %vm1113_vm1, 0, %v1112_v33  ;;  %v1119_v44 = vmin.u32 %v542_v36, %v540_v34  ;;  %v570_v29 = vand.u32 3, %v569_v24  ;;  %vm678_vm15 = vcmp.eq.s32.totalorder %v673_v30, 2 }
  0x6b   : > { %v340_v37 = vsub.s32 32, %v339_v63  ;;  %v341_v38 = vshll.u32 %v332_v25, %v339_v63  ;;  %v344_v39 = vsub.s32 4294967266, %v339_v63  ;;  %vm692_vm1 = vcmask 1041408  }
  0x6c   : > { %v544_v50 = vclz %v1119_v44  ;;  %vm575_vm14 = vcmp.eq.s32.totalorder %v570_v29, 2 }
  0x6d   : > { %v342_v46 = vshrl.u32 %v324_v35, %v340_v37  ;;  %v345_v47 = vadd.s32 127, %v344_v39 }
  0x6e   : > { %v1120_v53 = vadd.s32 4294967294, %v544_v50 }
  0x6f   : > { %v343_v51 = vor.u32 %v342_v46, %v341_v38  ;;  %v346_v52 = vshll.u32 %v345_v47, 23 }
  0x70   : > { %vm1121_vm2 = vcmp.lt.s32.totalorder %v1120_v53, 0 }
  0x71   : > { %v347_v54 = vor.u32 4788187, %v346_v52  ;;  %v350_v55 = vcvt.s32.f32 %v343_v51  ;;  %v547_v48 = vsel %vm1121_vm2, 0, %v1120_v53  ;;  %vm572_vm2 = vcmp.eq.s32.totalorder %v570_v29, 0 }
  0x72   : > { %v548_v49 = vsub.s32 32, %v547_v48  ;;  %v549_v59 = vshll.u32 %v540_v34, %v547_v48  ;;  %v552_v58 = vsub.s32 4294967266, %v547_v48  ;;  %v831_v48 = vld [vmem:[%s1613_s3] sm:$0xff] }
  0x73   : > { %v348_v57 = vand.u32 2147483647, %v347_v54 }
  0x74   : > { %v550_v1 = vshrl.u32 %v532_v56, %v548_v49  ;;  %v553_v2 = vadd.s32 127, %v552_v58 }
  0x75   : > { %v351_v60 = vmul.f32 %v350_v55, %v348_v57  ;;  %v701_v57 = vld [vmem:[%s1611_s1 + $0x18] sm:$0xff] }
  0x76   : > { %v551_v62 = vor.u32 %v550_v1, %v549_v59  ;;  %v554_v4 = vshll.u32 %v553_v2, 23 }
  0x77   : > { %v352_v3 = vxor.u32 2147483648, %v351_v60 }
  0x78   : > { %v555_v7 = vor.u32 4788187, %v554_v4  ;;  %v558_v8 = vcvt.s32.f32 %v551_v62 }
  0x79   : > { %v353_v61 = vsel %vm270_vm3, %v352_v3, %v351_v60  ;;  %vm675_vm3 = vcmp.eq.s32.totalorder %v673_v30, 0 }
  0x7a   : > { %v356_v6 = vsel %vm269_vm4, %v1463_v41, %v353_v61  ;;  %v556_v9 = vand.u32 2147483647, %v555_v7  ;;  %vm694_vm4 = vcmask 1043456  }
  0x7b   : > { %1254 = vcosq.f32 %v356_v6 }
  0x7c   : > { %1256 = vsinq.f32 %v356_v6  ;;  %v559_v12 = vmul.f32 %v558_v8, %v556_v9 }
  0x7e   : > { %v560_v43 = vxor.u32 2147483648, %v559_v12 }
  0x80   : > { %v561_v15 = vsel %vm478_vm5, %v560_v43, %v559_v12  ;;  %vm571_vm5 = vcmp.lt.s32.totalorder %v570_v29, 2  ;;  %v833_v12 = vld [vmem:[%s1613_s3 + $0x10] sm:$0xff] }
  0x81   : > { %v564_v17 = vsel %vm477_vm6, %v1466_v42, %v561_v15  ;;  %vm674_vm6 = vcmp.lt.s32.totalorder %v673_v30, 2 }
  0x82   : > { %1258 = vcosq.f32 %v564_v17 }
  0x83   : > { %1260 = vsinq.f32 %v564_v17 }
  0x88   : > { %v1255_v21 = vpop.eup %1254 }
  0x89   : > { %v1257_v22 = vpop.eup %1256  ;;  %v368_v23 = vxor.u32 2147483648, %v1255_v21 }
  0x8a   : > { %v365_v45 = vxor.u32 2147483648, %v1257_v22 }
  0x8b   : > { %v369_v25 = vsel %vm367_vm7, %v368_v23, %v1257_v22  ;;  %v472_v11 = vsel %vm470_vm8, %v368_v23, %v1257_v22  ;;  %vm568_vm7 = vweird.f32 %v1466_v42  ;;  %vm696_vm8 = vcmask 1045504   ;;  %v699_v42 = vld [vmem:[%s1611_s1 + $0x8] sm:$0xff] }
  0x8c   : > { %v366_v26 = vsel %vm364_vm9, %v1255_v21, %v365_v45  ;;  %v469_v27 = vsel %vm467_vm10, %v1255_v21, %v365_v45  ;;  %vm859_vm9 = vcmask 261120  }
  0x8d   : > { %v370_v28 = vsel %vm363_vm11, %v366_v26, %v369_v25  ;;  %v473_v31 = vsel %vm466_vm12, %v469_v27, %v472_v11  ;;  %1177 = vmatprep.mubr.msk.f32.mxu1 %vm859_vm9, %v831_v48 }
  0x8e   : > { %v371_v32 = vsel %vm360_vm13, nan, %v370_v28  ;;  %v474_v34 = vsel %vm360_vm13, nan, %v473_v31  ;;  %v961_v28 = vld [vmem:[%s1615_s5] sm:$0xf] }
  0x8f   : > { %v684_v33 = vrot.slane %v371_v32, 6  ;;  %v1259_v35 = vpop.eup %1258  ;;  %v687_v37 = vrot.slane %v474_v34, 4 }
  0x90   : > { %v1261_v63 = vpop.eup %1260  ;;  %v576_v36 = vxor.u32 2147483648, %v1259_v35 }
  0x91   : > { %v573_v41 = vxor.u32 2147483648, %v1261_v63  ;;  %v693_v44 = vsel %vm692_vm1, %v1460_v40, %v684_v33  ;;  %v700_v40 = vld [vmem:[%s1611_s1 + $0x10] sm:$0xff] }
  0x92   : > { %v577_v38 = vsel %vm575_vm14, %v576_v36, %v1261_v63  ;;  %v680_v39 = vsel %vm678_vm15, %v576_v36, %v1261_v63  ;;  %v695_v54 = vsel %vm694_vm4, %v693_v44, %v687_v37  ;;  %v724_v49 = vpop.permute.xlu0 %723 }
  0x93   : > { %v574_v46 = vsel %vm572_vm2, %v1259_v35, %v573_v41  ;;  %v677_v47 = vsel %vm675_vm3, %v1259_v35, %v573_v41  ;;  %v714_v58 = vpop.permute.xlu1 %713 }
  0x94   : > { %v578_v50 = vsel %vm571_vm5, %v574_v46, %v577_v38  ;;  %v681_v51 = vsel %vm674_vm6, %v677_v47, %v680_v39 }
  0x95   : > { %v579_v52 = vsel %vm568_vm7, nan, %v578_v50  ;;  %v682_v53 = vsel %vm568_vm7, nan, %v681_v51 }
  0x96   : > { %v690_v55 = vrot.slane %v579_v52, 2  ;;  %1159 = vmatprep.subr.msk.mxu0 %vm692_vm1, %v682_v53  ;;  %v719_v2 = vpop.permute.xlu0 %718 }
  0x97   : > { %1160 = vmatpush3.msk.msra.mxu0 %vm692_vm1, %v682_v53  ;;  %v709_v5 = vpop.permute.xlu1 %708 }
  0x98   : > { %v697_v56 = vsel %vm696_vm8, %v695_v54, %v690_v55 }
  0x99   : > { %1161 = vmatprep.subr.mxu0 %v697_v56 }
  0x9a   : > { %1162 = vmatpush3.msra.mxu0 %v697_v56  ;;  %v857_v43 = vpop.permute.xlu0 %856 }
  0x9b   : > { %1164 = vmatmul.mubr.msk.f32.vlgmr.msra.gmra.mxu0 %vm726_vm0, %v699_v42  ;;  %1183 = vmatprep.subr.mxu0 %v1331_v14  ;;  %v852_v16 = vpop.permute.xlu1 %851 }
  0x9c   : > { %1166 = vmatprep.mubr.msk.f32.mxu0 %vm726_vm0, %v700_v40 }
  0x9e   : > { %v847_v20 = vpop.permute.xlu0 %846 }
  0x9f   : > { %1167 = vmatmul.mubr.msk.f32.gmra.mxu0 %vm726_vm0, %v701_v57  ;;  %vm1332_vm0 = vmmov 0   ;;  %v842_v45 = vpop.permute.xlu1 %841 }
  0xa0   : > { %1191 = vmatprep.mubr.msk.f32.mxu0 %vm1332_vm0, %v1331_v14 }
  0xa2   : > { %v966_v29 = vpop.permute.xlu0 %965 }
 0x15b   : > { %v1165_v59 = vpop.f32.mrf.mxu0 }
 0x15c   : > { %v814_v62 = vadd.f32 %v1165_v59, %v714_v58 }
 0x15d   : > { %v808_v60 = vpop.f32.mrf.mxu0 }
 0x15e   : > { %v809_v6 = vadd.f32 %v808_v60, %v709_v5  ;;  %v828_v8 = vmax.f32 %v814_v62, 0.0 }
 0x15f   : > { %v1168_v0 = vpop.f32.mrf.mxu0 }
 0x160   : > { %v824_v1 = vadd.f32 %v1168_v0, %v724_v49  ;;  %v827_v9 = vmax.f32 %v809_v6, 0.0 }
 0x161   : > { %v818_v3 = vpop.f32.mrf.mxu0 }
 0x162   : > { %v830_v4 = vmax.f32 %v824_v1, 0.0  ;;  %v819_v61 = vadd.f32 %v818_v3, %v719_v2 }
 0x164   : > { %v829_v7 = vmax.f32 %v819_v61, 0.0  ;;  %1169 = vmatprep.subr.mxu1 %v830_v4 }
 0x165   : > { %1170 = vmatpush3.msra.mxu1 %v830_v4 }
 0x166   : > { %1171 = vmatprep.subr.mxu1 %v829_v7 }
 0x167   : > { %1172 = vmatpush3.msra.mxu1 %v829_v7 }
 0x168   : > { %1173 = vmatprep.subr.mxu1 %v828_v8 }
 0x169   : > { %1174 = vmatpush3.msra.mxu1 %v828_v8 }
 0x16a   : > { %1175 = vmatprep.subr.mxu1 %v827_v9 }
 0x16b   : > { %1176 = vmatpush3.msra.mxu1 %v827_v9 }
 0x16c   : > { %1178 = vmatmul.mubr.msk.f32.vlgmr.msra.gmra.mxu1 %vm859_vm9, %v832_v10 }
 0x16d   : > { %1180 = vmatprep.mubr.msk.f32.mxu1 %vm859_vm9, %v833_v12 }
 0x170   : > { %1181 = vmatmul.mubr.msk.f32.gmra.mxu1 %vm859_vm9, %v834_v13 }
 0x22c   : > { %v1179_v15 = vpop.f32.mrf.mxu1 }
 0x22d   : > { %v944_v22 = vadd.f32 %v1179_v15, %v847_v20 }
 0x22e   : > { %v938_v17 = vpop.f32.mrf.mxu1 }
 0x22f   : > { %v939_v25 = vadd.f32 %v938_v17, %v842_v45  ;;  %v958_v26 = vmax.f32 %v944_v22, 0.0 }
 0x230   : > { %v1182_v18 = vpop.f32.mrf.mxu1 }
 0x231   : > { %v954_v19 = vadd.f32 %v1182_v18, %v857_v43  ;;  %v957_v27 = vmax.f32 %v939_v25, 0.0 }
 0x232   : > { %v948_v21 = vpop.f32.mrf.mxu1 }
 0x233   : > { %v960_v23 = vmax.f32 %v954_v19, 0.0  ;;  %v949_v24 = vadd.f32 %v948_v21, %v852_v16 }
 0x235   : > { %v959_v11 = vmax.f32 %v949_v24, 0.0  ;;  %1184 = vmatpush3.msra.mxu0 %v960_v23 }
 0x236   : > { %1185 = vmatprep.subr.mxu0 %v1331_v14 }
 0x237   : > { %1186 = vmatpush3.msra.mxu0 %v959_v11 }
 0x238   : > { %1187 = vmatprep.subr.mxu0 %v1331_v14 }
 0x239   : > { %1188 = vmatpush3.msra.mxu0 %v958_v26 }
 0x23a   : > { %1189 = vmatprep.subr.mxu0 %v1331_v14 }
 0x23b   : > { %1190 = vmatpush3.msra.mxu0 %v957_v27 }
 0x23c   : > { %1192 = vmatmul.mubr.msk.f32.vlgmr.msra.gmra.mxu0 %vm859_vm9, %v961_v28 }
 0x2fc   : > { %v1037_v30 = vpop.f32.mrf.mxu0 }
 0x2fd   : > { %v1038_v31 = vadd.f32 %v1037_v30, %v966_v29 }
 0x2fe   : > { %v1193_v32 = vpop.f32.mrf.mxu0 }
 0x2ff   : > { %1041 = vst [vmem:[%s231_s30] sm:$0xf] %v1038_v31 }
 0x300   : > { %1275 = shalt.err (!%p1272_p2)
}
 0x301   : > { %s1276_s20 = scalar_lea.hbm %s1575_s15, 64  ;;  %s1280_s23 = scalar_lea.hbm %s1617_s7, 128 }
 0x302   : > { %p1277_p3 = scmp.ne.s32.totalorder %s1575_s15, %s1276_s20  ;;  %p1281_p8 = scmp.lt.s32.totalorder %s1575_s15, %s1617_s7 }
 0x303   : > { %p1282_p9 = scmp.lt.s32.totalorder %s1280_s23, %s1276_s20 }
 0x304   : > { %p1278_p4 = pnand %p1277_p3, %p1415_p5 }
 0x305   : > { %p1283_p10 = por %p1282_p9, %p1281_p8 }
 0x306   : > { %p1279_p7 = pneg %p1278_p4 }
 0x308   : > { %p1284_p11 = pnand %p1283_p10, %p1279_p7 }
 0x30a   : > { %1287 = shalt.err (!%p1284_p11)
}
 0x30b   : > { %1204 = dma.vmem_to_hbm [thread:$0]  (%p1415_p5), %s1057_s9, 64, %s1575_s15, %s1043_s16  }
 0x30c PF: > { %p1210_p12 = scmp.ge.s32.totalorder %s1322_s29, 2  ;;  %s1068_s30 = sand.u32 1, %s1310_s26  }
 0x30d   : > { %s1069_s10 = scalar_lea.sflag [#allocation5], %s1068_s30 }
 0x30e   : > { %p1207_p13 = pnand %p1210_p12, %p1419_p6 }
 0x310   : > { %p1208_p0 = pneg %p1207_p13 }
 0x312   : > { %1305 = dma.done.wait (%p1208_p0), %s1069_s10, 64  }
 0x313   : > { %1307 = vsyncadd (%p1208_p0), %s1069_s10, 4294967232  ;;  %p18_p1 = scmp.ge.s32.totalorder %s1402_s8, 4   ;;  %s1620_s26 = smov %s1314_s27 }
 0x314   : > { %s1621_s27 = smov %s1318_s28  ;;  %s1622_s28 = smov %s1413_s11 }
 0x315   : > { %s1623_s29 = smov %s1402_s8  ;;  %20 = sbr.rel (!%p18_p1) target bundleno = 5 (0x5), region = 76 }
 0x31a   :  { %1074 = vsyncpa [#allocation5], 1 }
 0x31b   :  { %1076 = vsyncpa [#allocation5 + $0x1], 1 }

</bundles_post_ra>
